<compile_context>
chip_gen: v7x
topology: tpu7x:2x2x1
jax: 0.10.0
libtpu: 0.0.40
codegen_flags: <defaults>
</compile_context>

<pallas_src>
import jax
import jax.numpy as jnp
from jax.experimental import pallas as pl
from jax.experimental.pallas import tpu as pltpu


def _diffract_kernel(hf_ref, hr_ref, tf_ref, tr_ref, kf_ref, kr_ref):
    """Complex masking for both optical paths on interleaved float planes.

    h*_ref : (2, Lt)      row 0 = h0 per lane, row 1 = h1 per lane.
    t*_ref : (2, bt, Lt)  channel-major FFT planes, re/im interleaved in lanes.
    k*_ref : (2, bt, Lt)  outputs, same layout.
    With real h:  k0 = h0*t0 - h1*t1 ;  k1 = h0*t1 + h1*t0.
    """
    def path(h_ref, t_ref, o_ref):
        a = h_ref[0:1, :]            # (1, Lt) -> broadcasts over the batch tile
        b = h_ref[1:2, :]
        t0 = t_ref[0]                # (bt, Lt)
        t1 = t_ref[1]
        o_ref[0] = a * t0 - b * t1
        o_ref[1] = a * t1 + b * t0

    path(hf_ref, tf_ref, kf_ref)
    path(hr_ref, tr_ref, kr_ref)


def _vmem_capacity_bytes():
    try:
        return int(pltpu.get_tpu_info().vmem_capacity_bytes)
    except Exception:
        return 64 << 20              # conservative (v7x-sized) fallback


_LANE_TILE_TARGET = 16384            # lanes per block (multiple of 128)


def _choose_tiles(B, L, budget_bytes):
    """Pick (batch_tile, lane_tile) so the double-buffered set fits the budget."""
    if L <= _LANE_TILE_TARGET:
        lt = L                                        # full dim: always legal
    else:
        nl = pl.cdiv(L, _LANE_TILE_TARGET)
        lt = min(L, ((pl.cdiv(L, nl) + 127) // 128) * 128)   # multiple of 128
    # double-buffered bytes per step ~= 2 * 4B * (8*bt*lt + 4*lt) ~= 64*bt*lt
    bt = budget_bytes // (64 * lt)
    if bt >= B:
        bt = B
    else:
        bt = min(B, max(8, (bt // 8) * 8))            # sublane tiles multiple of 8
    return int(bt), int(lt)


def _diffract_mask(hf, hr, tempf, tempr):
    """hf/hr: (H, W, 2) float32; tempf/tempr: (B, H, W, 2) complex64.

    Returns (kf_space, kr_space): (B, H, W, 2) complex64 each.
    """
    B, H, W, _ = tempf.shape
    HW = H * W
    L = 2 * HW                                        # re/im interleaved lanes

    def h_coef(h):
        # (H, W, 2) -> (2, L): row 0 = h0 duplicated per (re, im) lane, row 1 = h1.
        h = h.astype(jnp.float32)
        return jnp.stack([jnp.repeat(h[..., 0].reshape(HW), 2),
                          jnp.repeat(h[..., 1].reshape(HW), 2)], axis=0)

    def to_planes(t):
        # complex (B, H, W, 2) -> float32 (2, B, L): channel-major, re/im interleaved.
        tch = jnp.moveaxis(t, -1, 0)                                  # (2, B, H, W)
        return jnp.stack([jnp.real(tch), jnp.imag(tch)],
                         axis=-1).astype(jnp.float32).reshape(2, B, L)

    def to_complex(kp):
        # float32 (2, B, L) -> complex64 (B, H, W, 2)
        k = kp.reshape(2, B, HW, 2)
        c = jax.lax.complex(k[..., 0], k[..., 1])                     # (2, B, HW)
        return jnp.moveaxis(c, 0, -1).reshape(B, H, W, 2)

    hf_c, hr_c = h_coef(hf), h_coef(hr)
    tf_p, tr_p = to_planes(tempf), to_planes(tempr)

    cap = _vmem_capacity_bytes()
    bt, lt = _choose_tiles(B, L, (3 * cap) // 8)
    grid = (pl.cdiv(B, bt), pl.cdiv(L, lt))

    # Scoped VMEM: double-buffered in+out+h blocks plus slack, capped at 3/4 of
    # physical VMEM (<= 48 MiB on v7x's 64 MiB parts, roomier on v5e/v6e).
    step_bytes = 4 * (8 * bt * lt + 4 * lt)
    vmem_limit = int(min((3 * cap) // 4,
                         max(2 * step_bytes + (16 << 20), 32 << 20)))

    h_spec = pl.BlockSpec((2, lt), lambda i, j: (0, j))
    t_spec = pl.BlockSpec((2, bt, lt), lambda i, j: (0, i, j))

    kf_p, kr_p = pl.pallas_call(
        _diffract_kernel,
        out_shape=(jax.ShapeDtypeStruct((2, B, L), jnp.float32),
                   jax.ShapeDtypeStruct((2, B, L), jnp.float32)),
        grid=grid,
        in_specs=[h_spec, h_spec, t_spec, t_spec],
        out_specs=(t_spec, t_spec),
        compiler_params=pltpu.CompilerParams(
            dimension_semantics=("parallel", "parallel"),
            vmem_limit_bytes=vmem_limit,
        ),
    )(hf_c, hr_c, tf_p, tr_p)

    return to_complex(kf_p), to_complex(kr_p)


def make_diffractive_params(size=16, distance=0.03, ll=0.08):
    """Deterministic re-creation of the module's hf / hr buffers (size x size x 2)."""
    wl = 3.0e8 / 4.0e11
    fi = 1.0 / ll
    wn = 2.0 * 3.1415926 / wl
    coords = (jnp.arange(size, dtype=jnp.float32) - size // 2) * fi
    phi = coords[:, None] ** 2 + coords[None, :] ** 2          # (size, size)
    base = jnp.exp(1j * wn * distance)
    hf_c = jnp.fft.fftshift(base * jnp.exp(-1j * wl * jnp.pi * distance * phi))
    hr_c = jnp.fft.fftshift(base * jnp.exp(+1j * wl * jnp.pi * distance * phi))
    hf = jnp.stack([jnp.real(hf_c), jnp.imag(hf_c)], axis=-1).astype(jnp.float32)
    hr = jnp.stack([jnp.real(hr_c), jnp.imag(hr_c)], axis=-1).astype(jnp.float32)
    return hf, hr


def diffractive_layer_forward(wavesf, wavesr, hf, hr):
    # torch.fft.fftn default = transform over ALL axes (incl. batch and the
    # trailing size-2 axis); jnp.fft.fftn with axes=None matches that exactly.
    tempf = jnp.fft.fftn(wavesf)
    tempr = jnp.fft.fftn(wavesr)
    kf_space, kr_space = _diffract_mask(hf, hr, tempf, tempr)
    angular_spectrumf = jnp.fft.ifftn(kf_space)
    angular_spectrumr = jnp.fft.ifftn(kr_space)
    return angular_spectrumf, angular_spectrumr


def _ref_forward(wavesf, wavesr, hf, hr):
    """Pure-JAX reference mirroring the PyTorch forward, for validation."""
    tempf = jnp.fft.fftn(wavesf)
    tempr = jnp.fft.fftn(wavesr)
    kf_r = hf[..., 0] * tempf[..., 0] - hf[..., 1] * tempf[..., 1]
    kf_i = hf[..., 0] * tempf[..., 1] + hf[..., 1] * tempf[..., 0]
    kr_r = hr[..., 0] * tempr[..., 0] - hr[..., 1] * tempr[..., 1]
    kr_i = hr[..., 0] * tempr[..., 1] + hr[..., 1] * tempr[..., 0]
    return (jnp.fft.ifftn(jnp.stack([kf_r, kf_i], axis=-1)),
            jnp.fft.ifftn(jnp.stack([kr_r, kr_i], axis=-1)))


if __name__ == "__main__":
    B, size = 2, 16   # small stand-in for the module's size=200
    key = jax.random.PRNGKey(0)
    k1, k2 = jax.random.split(key)
    wavesf = jax.random.normal(k1, (B, size, size, 2), dtype=jnp.float32)
    wavesr = jax.random.normal(k2, (B, size, size, 2), dtype=jnp.float32)
    hf, hr = make_diffractive_params(size=size)

    angf, angr = jax.jit(diffractive_layer_forward)(wavesf, wavesr, hf, hr)
    jax.block_until_ready((angf, angr))

    rf, rr = _ref_forward(wavesf, wavesr, hf, hr)
    assert angf.shape == (B, size, size, 2) and angr.shape == (B, size, size, 2)
    assert jnp.allclose(angf, rf, atol=1e-4, rtol=1e-4)
    assert jnp.allclose(angr, rr, atol=1e-4, rtol=1e-4)
    print("KERNEL_OK")
</pallas_src>

<mosaic_0001>
module attributes {stable_mosaic.version = 11 : i64} {
  func.func @_diffract_kernel(%arg0: i32, %arg1: i32, %arg2: memref<2x512xf32, #tpu.memory_space<vmem>>, %arg3: memref<2x512xf32, #tpu.memory_space<vmem>>, %arg4: memref<2x2x512xf32, #tpu.memory_space<vmem>>, %arg5: memref<2x2x512xf32, #tpu.memory_space<vmem>>, %arg6: memref<2x2x512xf32, #tpu.memory_space<vmem>>, %arg7: memref<2x2x512xf32, #tpu.memory_space<vmem>>) attributes {dimension_semantics = [#tpu.dimension_semantics<parallel>, #tpu.dimension_semantics<parallel>], iteration_bounds = array<i64: 1, 1>, scalar_prefetch = 0 : i64, scratch_operands = 0 : i64, tpu.core_type = #tpu.core_type<tc>, window_params = [{transform_indices = @transform_0, window_bounds = array<i64: 2, 512>}, {transform_indices = @transform_1, window_bounds = array<i64: 2, 512>}, {transform_indices = @transform_2, window_bounds = array<i64: 2, 2, 512>}, {transform_indices = @transform_3, window_bounds = array<i64: 2, 2, 512>}, {transform_indices = @transform_4, window_bounds = array<i64: 2, 2, 512>}, {transform_indices = @transform_5, window_bounds = array<i64: 2, 2, 512>}]} {
    %c0 = arith.constant 0 : index
    %c0_0 = arith.constant 0 : index
    %0 = vector.load %arg2[%c0, %c0_0] : memref<2x512xf32, #tpu.memory_space<vmem>>, vector<1x512xf32>
    %c1 = arith.constant 1 : index
    %c0_1 = arith.constant 0 : index
    %1 = vector.load %arg2[%c1, %c0_1] : memref<2x512xf32, #tpu.memory_space<vmem>>, vector<1x512xf32>
    %c0_2 = arith.constant 0 : index
    %c0_3 = arith.constant 0 : index
    %c0_4 = arith.constant 0 : index
    %2 = vector.load %arg4[%c0_2, %c0_3, %c0_4] : memref<2x2x512xf32, #tpu.memory_space<vmem>>, vector<1x2x512xf32>
    %3 = vector.shape_cast %2 : vector<1x2x512xf32> to vector<2x512xf32>
    %c1_5 = arith.constant 1 : index
    %c0_6 = arith.constant 0 : index
    %c0_7 = arith.constant 0 : index
    %4 = vector.load %arg4[%c1_5, %c0_6, %c0_7] : memref<2x2x512xf32, #tpu.memory_space<vmem>>, vector<1x2x512xf32>
    %5 = vector.shape_cast %4 : vector<1x2x512xf32> to vector<2x512xf32>
    %6 = vector.broadcast %0 : vector<1x512xf32> to vector<2x512xf32>
    %7 = arith.mulf %6, %3 : vector<2x512xf32>
    %8 = vector.broadcast %1 : vector<1x512xf32> to vector<2x512xf32>
    %9 = arith.mulf %8, %5 : vector<2x512xf32>
    %10 = arith.subf %7, %9 : vector<2x512xf32>
    %c0_8 = arith.constant 0 : index
    %c0_9 = arith.constant 0 : index
    %c0_10 = arith.constant 0 : index
    %11 = vector.load %arg6[%c0_8, %c0_9, %c0_10] : memref<2x2x512xf32, #tpu.memory_space<vmem>>, vector<1x2x512xf32>
    %12 = vector.shape_cast %11 : vector<1x2x512xf32> to vector<2x512xf32>
    %13 = vector.shape_cast %10 : vector<2x512xf32> to vector<1x2x512xf32>
    tpu.vector_store %arg6[%c0_8, %c0_9, %c0_10], %13 {strides = array<i32>} : memref<2x2x512xf32, #tpu.memory_space<vmem>>, vector<1x2x512xf32>,
    %14 = vector.broadcast %0 : vector<1x512xf32> to vector<2x512xf32>
    %15 = arith.mulf %14, %5 : vector<2x512xf32>
    %16 = vector.broadcast %1 : vector<1x512xf32> to vector<2x512xf32>
    %17 = arith.mulf %16, %3 : vector<2x512xf32>
    %18 = arith.addf %15, %17 : vector<2x512xf32>
    %c1_11 = arith.constant 1 : index
    %c0_12 = arith.constant 0 : index
    %c0_13 = arith.constant 0 : index
    %19 = vector.load %arg6[%c1_11, %c0_12, %c0_13] : memref<2x2x512xf32, #tpu.memory_space<vmem>>, vector<1x2x512xf32>
    %20 = vector.shape_cast %19 : vector<1x2x512xf32> to vector<2x512xf32>
    %21 = vector.shape_cast %18 : vector<2x512xf32> to vector<1x2x512xf32>
    tpu.vector_store %arg6[%c1_11, %c0_12, %c0_13], %21 {strides = array<i32>} : memref<2x2x512xf32, #tpu.memory_space<vmem>>, vector<1x2x512xf32>,
    %c0_14 = arith.constant 0 : index
    %c0_15 = arith.constant 0 : index
    %22 = vector.load %arg3[%c0_14, %c0_15] : memref<2x512xf32, #tpu.memory_space<vmem>>, vector<1x512xf32>
    %c1_16 = arith.constant 1 : index
    %c0_17 = arith.constant 0 : index
    %23 = vector.load %arg3[%c1_16, %c0_17] : memref<2x512xf32, #tpu.memory_space<vmem>>, vector<1x512xf32>
    %c0_18 = arith.constant 0 : index
    %c0_19 = arith.constant 0 : index
    %c0_20 = arith.constant 0 : index
    %24 = vector.load %arg5[%c0_18, %c0_19, %c0_20] : memref<2x2x512xf32, #tpu.memory_space<vmem>>, vector<1x2x512xf32>
    %25 = vector.shape_cast %24 : vector<1x2x512xf32> to vector<2x512xf32>
    %c1_21 = arith.constant 1 : index
    %c0_22 = arith.constant 0 : index
    %c0_23 = arith.constant 0 : index
    %26 = vector.load %arg5[%c1_21, %c0_22, %c0_23] : memref<2x2x512xf32, #tpu.memory_space<vmem>>, vector<1x2x512xf32>
    %27 = vector.shape_cast %26 : vector<1x2x512xf32> to vector<2x512xf32>
    %28 = vector.broadcast %22 : vector<1x512xf32> to vector<2x512xf32>
    %29 = arith.mulf %28, %25 : vector<2x512xf32>
    %30 = vector.broadcast %23 : vector<1x512xf32> to vector<2x512xf32>
    %31 = arith.mulf %30, %27 : vector<2x512xf32>
    %32 = arith.subf %29, %31 : vector<2x512xf32>
    %c0_24 = arith.constant 0 : index
    %c0_25 = arith.constant 0 : index
    %c0_26 = arith.constant 0 : index
    %33 = vector.load %arg7[%c0_24, %c0_25, %c0_26] : memref<2x2x512xf32, #tpu.memory_space<vmem>>, vector<1x2x512xf32>
    %34 = vector.shape_cast %33 : vector<1x2x512xf32> to vector<2x512xf32>
    %35 = vector.shape_cast %32 : vector<2x512xf32> to vector<1x2x512xf32>
    tpu.vector_store %arg7[%c0_24, %c0_25, %c0_26], %35 {strides = array<i32>} : memref<2x2x512xf32, #tpu.memory_space<vmem>>, vector<1x2x512xf32>,
    %36 = vector.broadcast %22 : vector<1x512xf32> to vector<2x512xf32>
    %37 = arith.mulf %36, %27 : vector<2x512xf32>
    %38 = vector.broadcast %23 : vector<1x512xf32> to vector<2x512xf32>
    %39 = arith.mulf %38, %25 : vector<2x512xf32>
    %40 = arith.addf %37, %39 : vector<2x512xf32>
    %c1_27 = arith.constant 1 : index
    %c0_28 = arith.constant 0 : index
    %c0_29 = arith.constant 0 : index
    %41 = vector.load %arg7[%c1_27, %c0_28, %c0_29] : memref<2x2x512xf32, #tpu.memory_space<vmem>>, vector<1x2x512xf32>
    %42 = vector.shape_cast %41 : vector<1x2x512xf32> to vector<2x512xf32>
    %43 = vector.shape_cast %40 : vector<2x512xf32> to vector<1x2x512xf32>
    tpu.vector_store %arg7[%c1_27, %c0_28, %c0_29], %43 {strides = array<i32>} : memref<2x2x512xf32, #tpu.memory_space<vmem>>, vector<1x2x512xf32>,
    return
  }
  func.func @transform_0(%arg0: i32, %arg1: i32) -> (i32, i32) {
    %c0_i32 = arith.constant 0 : i32
    %c0_i32_0 = arith.constant 0 : i32
    return %c0_i32, %arg1 : i32, i32
  }
  func.func @transform_1(%arg0: i32, %arg1: i32) -> (i32, i32) {
    %c0_i32 = arith.constant 0 : i32
    %c0_i32_0 = arith.constant 0 : i32
    return %c0_i32, %arg1 : i32, i32
  }
  func.func @transform_2(%arg0: i32, %arg1: i32) -> (i32, i32, i32) {
    %c0_i32 = arith.constant 0 : i32
    %c0_i32_0 = arith.constant 0 : i32
    return %c0_i32, %arg0, %arg1 : i32, i32, i32
  }
  func.func @transform_3(%arg0: i32, %arg1: i32) -> (i32, i32, i32) {
    %c0_i32 = arith.constant 0 : i32
    %c0_i32_0 = arith.constant 0 : i32
    return %c0_i32, %arg0, %arg1 : i32, i32, i32
  }
  func.func @transform_4(%arg0: i32, %arg1: i32) -> (i32, i32, i32) {
    %c0_i32 = arith.constant 0 : i32
    %c0_i32_0 = arith.constant 0 : i32
    return %c0_i32, %arg0, %arg1 : i32, i32, i32
  }
  func.func @transform_5(%arg0: i32, %arg1: i32) -> (i32, i32, i32) {
    %c0_i32 = arith.constant 0 : i32
    %c0_i32_0 = arith.constant 0 : i32
    return %c0_i32, %arg0, %arg1 : i32, i32, i32
  }
}

</mosaic_0001>

<bundles_post_ra>
// kernel: squeeze.10
= control target key start
LH: loop header
LB: loop body
LE: loop exit
PB: predicated region body
PF: predicated region fallthrough
CT: control target
= control target key end

     0   :  { %s7_s6 = smov 3  ;;  %s21_s9 = smov 3  ;;  %vm4_vm0 = vcmask 130048   ;;  %vm11_vm1 = vcmask 1048448   ;;  %vm18_vm2 = vcmask 917248   ;;  %vm25_vm3 = vcmask 786048   ;;  %s119_s0 = inlined_call_operand.vmem [shape: f32[16,16], index: 0, kind: input, shape index: {}]   ;;  %s120_s1 = inlined_call_operand.vmem [shape: f32[256], index: 1, kind: output, shape index: {}]  }
   0x1   :  { %v61_v0 = vld [vmem:[%s119_s0 + $0x7] ss:$8 sm:%s7_s6]   ;;  %s75_s10 = smov 112   ;;  %v63_v1 = vld [vmem:[%s119_s0 + $0x5] ss:$8 sm:%s21_s9]   ;;  %s14_s13 = smov 3 }
   0x2   :  { %9 = vrot.lane.b32.xlu0 %v61_v0, %s75_s10  ;;  %s76_s14 = smov 80   ;;  %v62_v2 = vld [vmem:[%s119_s0 + $0x6] ss:$8 sm:%s14_s13]   ;;  %s28_s17 = smov 3  ;;  %vm32_vm4 = vcmask 654848   ;;  %vm39_vm5 = vcmask 523648  }
   0x3   :  { %23 = vrot.lane.b32.xlu1 %v63_v1, %s76_s14  ;;  %v64_v3 = vld [vmem:[%s119_s0 + $0x4] ss:$8 sm:%s28_s17]   ;;  %s35_s20 = smov 3  ;;  %s42_s21 = smov 3  ;;  %vm46_vm6 = vcmask 392448   ;;  %vm53_vm7 = vcmask 261248  }
   0x4   :  { %s77_s22 = smov 96   ;;  %s78_s23 = smov 64   ;;  %v65_v4 = vld [vmem:[%s119_s0 + $0x3] ss:$8 sm:%s35_s20]   ;;  %v66_v5 = vld [vmem:[%s119_s0 + $0x2] ss:$8 sm:%s42_s21]  }
   0x5   :  { %s2_s26 = smov 3  ;;  %s49_s29 = smov 3 }
   0x6   :  { %16 = vrot.lane.b32.xlu0 %v62_v2, %s77_s22  ;;  %v3_v6 = vld [vmem:[%s119_s0] ss:$8 sm:%s2_s26]   ;;  %s79_s3 = smov 48   ;;  %s80_s4 = smov 32  }
   0x7   :  { %30 = vrot.lane.b32.xlu1 %v64_v3, %s78_s23  ;;  %5 = vst.msk [vmem:[#allocation0] sm:$0x3] %vm4_vm0, %v3_v6   ;;  %v67_v7 = vld [vmem:[%s119_s0 + $0x1] ss:$8 sm:%s49_s29]   ;;  %s81_s0 = smov 16  }
   0xa   :  { %37 = vrot.lane.b32.xlu0 %v65_v4, %s79_s3 }
   0xb   :  { %44 = vrot.lane.b32.xlu1 %v66_v5, %s80_s4 }
   0xe   :  { %51 = vrot.lane.b32.xlu0 %v67_v7, %s81_s0 }
  0x74   :  { %v10_v8 = vpop.permute.xlu0 %9  }
  0x75   :  { %12 = vst.msk [vmem:[#allocation0] sm:$0x3] %vm11_vm1, %v10_v8   ;;  %v24_v9 = vpop.permute.xlu1 %23  }
  0x78   :  { %v17_v10 = vpop.permute.xlu0 %16  }
  0x79   :  { %19 = vst.msk [vmem:[#allocation0] sm:$0x3] %vm18_vm2, %v17_v10   ;;  %v31_v11 = vpop.permute.xlu1 %30  }
  0x7a   :  { %26 = vst.msk [vmem:[#allocation0] sm:$0x3] %vm25_vm3, %v24_v9  }
  0x7b   :  { %33 = vst.msk [vmem:[#allocation0] sm:$0x3] %vm32_vm4, %v31_v11  }
  0x7c   :  { %v38_v12 = vpop.permute.xlu0 %37  }
  0x7d   :  { %40 = vst.msk [vmem:[#allocation0] sm:$0x3] %vm39_vm5, %v38_v12   ;;  %v45_v13 = vpop.permute.xlu1 %44  }
  0x7e   :  { %47 = vst.msk [vmem:[#allocation0] sm:$0x3] %vm46_vm6, %v45_v13  }
  0x80   :  { %v52_v14 = vpop.permute.xlu0 %51  }
  0x81   :  { %54 = vst.msk [vmem:[#allocation0] sm:$0x3] %vm53_vm7, %v52_v14  }
  0x88   :  { %v58_v15 = vld [vmem:[#allocation0] sm:$0x3] }
  0x89   :  { %60 = vst [vmem:[%s120_s1] sm:$0x3] %v58_v15 }

// kernel: diffractive_layer_forward.1
= control target key start
LH: loop header
LB: loop body
LE: loop exit
PB: predicated region body
PF: predicated region fallthrough
CT: control target
= control target key end

     0   :  { %v26_v0 = vlaneseq  ;;  %v364_v1 = vmov 1983009808   ;;  %s478_s0 = inlined_call_operand.vmem [shape: f32[2,512], index: 0, kind: input, shape index: {}]   ;;  %s479_s2 = inlined_call_operand.vmem [shape: f32[2,2,512], index: 2, kind: input, shape index: {}]   ;;  %s480_s3 = inlined_call_operand.vmem [shape: f32[2,2,512], index: 3, kind: input, shape index: {}]   ;;  %s481_s1 = inlined_call_operand.vmem [shape: f32[2,512], index: 1, kind: input, shape index: {}]   ;;  %s482_s4 = inlined_call_operand.vmem [shape: f32[2,2,512], index: 4, kind: output, shape index: {0}]   ;;  %s483_s5 = inlined_call_operand.vmem [shape: f32[2,2,512], index: 5, kind: output, shape index: {1}]  }
   0x1   :  { %v49_v2 = vunpack.c.l.s4 %v364_v1  ;;  %v19_v3 = vld [vmem:[%s478_s0] ss:$2 sm:$0xf]  ;;  %v354_v5 = vld [vmem:[%s479_s2 + $0x8] sm:$0xff] }
   0x2   :  { %v22_v4 = vld [vmem:[%s479_s2] sm:$0xff]  ;;  %v27_v6 = vshrl.u32 %v26_v0, 7  ;;  %v94_v10 = vcombine.high %v354_v5, %v354_v5  ;;  %v357_v47 = vld [vmem:[%s480_s3 + $0x8] sm:$0xff] }
   0x3   :  { %v353_v7 = vld [vmem:[%s478_s0 + $0x1] ss:$2 sm:$0xf]  ;;  %v47_v8 = vcombine.high %v22_v4, %v22_v4  ;;  %v50_v9 = vunpack.c.0.s8 %v49_v2  ;;  %v182_v46 = vld [vmem:[%s481_s1] ss:$2 sm:$0xf]  ;;  %v257_v59 = vcombine.high %v357_v47, %v357_v47 }
   0x4   :  { %v410_v11 = vld [vmem:[%s480_s3] sm:$0xff]  ;;  %v412_v12 = vsub.s32 0, %v27_v6  ;;  %v414_v13 = vsub.s32 1, %v27_v6  ;;  %v416_v14 = vsub.s32 2, %v27_v6  ;;  %v418_v15 = vsub.s32 3, %v27_v6 }
   0x5   :  { %v420_v16 = vsub.s32 %v50_v9, %v27_v6  ;;  %v210_v17 = vcombine.high %v410_v11, %v410_v11  ;;  %v356_v0 = vld [vmem:[%s481_s1 + $0x1] ss:$2 sm:$0xf] }
   0x6   :  { %v29_v18 = vrot.slane %v19_v3, %v412_v12  ;;  %v33_v19 = vrot.slane %v19_v3, %v414_v13  ;;  %v37_v20 = vrot.slane %v19_v3, %v416_v14  ;;  %v41_v21 = vrot.slane %v19_v3, %v418_v15 }
   0x7   :  { %v54_v22 = vrot.slane %v22_v4, %v420_v16  ;;  %v61_v23 = vrot.slane %v47_v8, %v420_v16  ;;  %v76_v24 = vrot.slane %v353_v7, %v412_v12  ;;  %v80_v25 = vrot.slane %v353_v7, %v414_v13 }
   0x8   :  { %v84_v26 = vrot.slane %v353_v7, %v416_v14  ;;  %v88_v27 = vrot.slane %v353_v7, %v418_v15  ;;  %v101_v28 = vrot.slane %v354_v5, %v420_v16  ;;  %v108_v29 = vrot.slane %v94_v10, %v420_v16 }
   0x9   :  { %v62_v30 = vcombine.high %v54_v22, %v54_v22  ;;  %v63_v31 = vcombine.high %v61_v23, %v61_v23  ;;  %v68_v32 = vmul.f32 %v54_v22, %v29_v18  ;;  %v70_v33 = vmul.f32 %v61_v23, %v37_v20 }
   0xa   :  { %v109_v34 = vcombine.high %v101_v28, %v101_v28  ;;  %v110_v35 = vcombine.high %v108_v29, %v108_v29  ;;  %v115_v36 = vmul.f32 %v101_v28, %v76_v24  ;;  %v117_v37 = vmul.f32 %v108_v29, %v84_v26 }
   0xb   :  { %v69_v38 = vmul.f32 %v62_v30, %v33_v19  ;;  %v71_v39 = vmul.f32 %v63_v31, %v41_v21  ;;  %v146_v40 = vmul.f32 %v101_v28, %v29_v18  ;;  %v148_v41 = vmul.f32 %v108_v29, %v37_v20 }
   0xc   :  { %v116_v42 = vmul.f32 %v109_v34, %v80_v25  ;;  %v118_v43 = vmul.f32 %v110_v35, %v88_v27  ;;  %v119_v44 = vsub.f32 %v68_v32, %v115_v36  ;;  %v121_v45 = vsub.f32 %v70_v33, %v117_v37 }
   0xd   :  { %v147_v48 = vmul.f32 %v109_v34, %v33_v19  ;;  %v149_v49 = vmul.f32 %v110_v35, %v41_v21  ;;  %v150_v50 = vmul.f32 %v76_v24, %v54_v22  ;;  %v151_v51 = vmul.f32 %v80_v25, %v62_v30 }
   0xe   :  { %v120_v52 = vsub.f32 %v69_v38, %v116_v42  ;;  %v122_v53 = vsub.f32 %v71_v39, %v118_v43  ;;  %v152_v54 = vmul.f32 %v84_v26, %v61_v23  ;;  %v153_v55 = vmul.f32 %v88_v27, %v63_v31 }
   0xf   :  { %v154_v56 = vadd.f32 %v150_v50, %v146_v40  ;;  %v155_v57 = vadd.f32 %v151_v51, %v147_v48  ;;  %v192_v58 = vrot.slane %v182_v46, %v412_v12  ;;  %v196_v2 = vrot.slane %v182_v46, %v414_v13 }
  0x10   :  { %v127_v60 = vcombine.low %v119_v44, %v120_v52  ;;  %v128_v61 = vcombine.low %v121_v45, %v122_v53  ;;  %v156_v62 = vadd.f32 %v152_v54, %v148_v41  ;;  %v157_v63 = vadd.f32 %v153_v55, %v149_v49 }
  0x11   :  { %v162_v1 = vcombine.low %v154_v56, %v155_v57  ;;  %v200_v3 = vrot.slane %v182_v46, %v416_v14  ;;  %v217_v4 = vrot.slane %v410_v11, %v420_v16  ;;  %v224_v8 = vrot.slane %v210_v17, %v420_v16 }
  0x12   :  { %v135_v5 = vrot.slane %v127_v60, %v420_v16  ;;  %v142_v6 = vrot.slane %v128_v61, %v420_v16  ;;  %v163_v7 = vcombine.low %v156_v62, %v157_v63  ;;  %v204_v10 = vrot.slane %v182_v46, %v418_v15 }
  0x13   :  { %v170_v9 = vrot.slane %v162_v1, %v420_v16  ;;  %v225_v18 = vcombine.high %v217_v4, %v217_v4  ;;  %v239_v19 = vrot.slane %v356_v0, %v412_v12  ;;  %v226_v22 = vcombine.high %v224_v8, %v224_v8 }
  0x14   :  { %v143_v20 = vcombine.low %v135_v5, %v142_v6  ;;  %v177_v21 = vrot.slane %v163_v7, %v420_v16  ;;  %v231_v23 = vmul.f32 %v217_v4, %v192_v58  ;;  %v243_v11 = vrot.slane %v356_v0, %v414_v13 }
  0x15   :  { %v247_v24 = vrot.slane %v356_v0, %v416_v14  ;;  %v251_v25 = vrot.slane %v356_v0, %v418_v15  ;;  %v233_v26 = vmul.f32 %v224_v8, %v200_v3  ;;  %v264_v27 = vrot.slane %v357_v47, %v420_v16 }
  0x16   :  { %145 = vst [vmem:[%s482_s4] sm:$0xff] %v143_v20  ;;  %v178_v17 = vcombine.low %v170_v9, %v177_v21  ;;  %v271_v12 = vrot.slane %v257_v59, %v420_v16  ;;  %v232_v28 = vmul.f32 %v225_v18, %v196_v2  ;;  %v234_v29 = vmul.f32 %v226_v22, %v204_v10 }
  0x17   :  { %v313_v30 = vmul.f32 %v239_v19, %v217_v4  ;;  %v315_v31 = vmul.f32 %v247_v24, %v224_v8  ;;  %v272_v13 = vcombine.high %v264_v27, %v264_v27  ;;  %v278_v15 = vmul.f32 %v264_v27, %v239_v19 }
  0x18   :  { %355 = vst [vmem:[%s482_s4 + $0x8] sm:$0xff] %v178_v17  ;;  %v273_v14 = vcombine.high %v271_v12, %v271_v12  ;;  %v280_v32 = vmul.f32 %v271_v12, %v247_v24  ;;  %v309_v33 = vmul.f32 %v264_v27, %v192_v58  ;;  %v311_v34 = vmul.f32 %v271_v12, %v200_v3 }
  0x19   :  { %v314_v35 = vmul.f32 %v243_v11, %v225_v18  ;;  %v316_v36 = vmul.f32 %v251_v25, %v226_v22  ;;  %v279_v37 = vmul.f32 %v272_v13, %v243_v11  ;;  %v282_v39 = vsub.f32 %v231_v23, %v278_v15 }
  0x1a   :  { %v281_v38 = vmul.f32 %v273_v14, %v251_v25  ;;  %v284_v40 = vsub.f32 %v233_v26, %v280_v32  ;;  %v310_v41 = vmul.f32 %v272_v13, %v196_v2  ;;  %v312_v42 = vmul.f32 %v273_v14, %v204_v10 }
  0x1b   :  { %v317_v43 = vadd.f32 %v313_v30, %v309_v33  ;;  %v319_v44 = vadd.f32 %v315_v31, %v311_v34  ;;  %v283_v45 = vsub.f32 %v232_v28, %v279_v37 }
  0x1c   :  { %v285_v46 = vsub.f32 %v234_v29, %v281_v38  ;;  %v318_v47 = vadd.f32 %v314_v35, %v310_v41  ;;  %v320_v48 = vadd.f32 %v316_v36, %v312_v42 }
  0x1d   :  { %v290_v49 = vcombine.low %v282_v39, %v283_v45 }
  0x1e   :  { %v291_v50 = vcombine.low %v284_v40, %v285_v46  ;;  %v325_v51 = vcombine.low %v317_v43, %v318_v47  ;;  %v326_v52 = vcombine.low %v319_v44, %v320_v48 }
  0x1f   :  { %v298_v53 = vrot.slane %v290_v49, %v420_v16 }
  0x20   :  { %v305_v54 = vrot.slane %v291_v50, %v420_v16  ;;  %v333_v55 = vrot.slane %v325_v51, %v420_v16  ;;  %v340_v56 = vrot.slane %v326_v52, %v420_v16 }
  0x22   :  { %v306_v57 = vcombine.low %v298_v53, %v305_v54  ;;  %v341_v58 = vcombine.low %v333_v55, %v340_v56 }
  0x24   :  { %308 = vst [vmem:[%s483_s5] sm:$0xff] %v306_v57  ;;  %358 = vst [vmem:[%s483_s5 + $0x8] sm:$0xff] %v341_v58 }

// kernel: custom-call
= control target key start
LH: loop header
LB: loop body
LE: loop exit
PB: predicated region body
PF: predicated region fallthrough
CT: control target
= control target key end

     0   :  { %s212_s0 = inlined_call_operand.vmem [shape: f32[2,16,16,2], index: 0, kind: input, shape index: {}]   ;;  %s213_s1 = inlined_call_operand.vmem [shape: f32[2,16,16,2], index: 1, kind: input, shape index: {}]   ;;  %s214_s2 = inlined_call_operand.vmem [shape: c64[2,16,16,2], index: 2, kind: output, shape index: {}]  }
   0x1   :  { %v5_v0 = vld [vmem:[%s212_s0] sm:$0xff]  ;;  %v72_v1 = vld [vmem:[%s212_s0 + $0x8] sm:$0xff]  ;;  %v74_v2 = vld [vmem:[%s212_s0 + $0x10] sm:$0xff] }
   0x2   :  { %6 = vst [vmem:[%s214_s2] sm:$0xff] %v5_v0  ;;  %73 = vst [vmem:[%s214_s2 + $0x8] sm:$0xff] %v72_v1  ;;  %v76_v3 = vld [vmem:[%s212_s0 + $0x18] sm:$0xff]  ;;  %v78_v4 = vld [vmem:[%s212_s0 + $0x20] sm:$0xff] }
   0x3   :  { %75 = vst [vmem:[%s214_s2 + $0x10] sm:$0xff] %v74_v2  ;;  %v80_v5 = vld [vmem:[%s212_s0 + $0x28] sm:$0xff]  ;;  %77 = vst [vmem:[%s214_s2 + $0x18] sm:$0xff] %v76_v3  ;;  %v82_v6 = vld [vmem:[%s212_s0 + $0x30] sm:$0xff] }
   0x4   :  { %79 = vst [vmem:[%s214_s2 + $0x20] sm:$0xff] %v78_v4  ;;  %81 = vst [vmem:[%s214_s2 + $0x28] sm:$0xff] %v80_v5  ;;  %v84_v7 = vld [vmem:[%s212_s0 + $0x38] sm:$0xff]  ;;  %v35_v8 = vld [vmem:[%s213_s1] sm:$0xff] }
   0x5   :  { %83 = vst [vmem:[%s214_s2 + $0x30] sm:$0xff] %v82_v6  ;;  %85 = vst [vmem:[%s214_s2 + $0x38] sm:$0xff] %v84_v7  ;;  %v87_v9 = vld [vmem:[%s213_s1 + $0x8] sm:$0xff]  ;;  %v89_v10 = vld [vmem:[%s213_s1 + $0x10] sm:$0xff] }
   0x6   :  { %86 = vst [vmem:[%s214_s2 + $0x40] sm:$0xff] %v35_v8  ;;  %v91_v11 = vld [vmem:[%s213_s1 + $0x18] sm:$0xff]  ;;  %88 = vst [vmem:[%s214_s2 + $0x48] sm:$0xff] %v87_v9  ;;  %v93_v12 = vld [vmem:[%s213_s1 + $0x20] sm:$0xff] }
   0x7   :  { %90 = vst [vmem:[%s214_s2 + $0x50] sm:$0xff] %v89_v10  ;;  %92 = vst [vmem:[%s214_s2 + $0x58] sm:$0xff] %v91_v11  ;;  %v95_v13 = vld [vmem:[%s213_s1 + $0x28] sm:$0xff]  ;;  %v97_v14 = vld [vmem:[%s213_s1 + $0x30] sm:$0xff] }
   0x8   :  { %94 = vst [vmem:[%s214_s2 + $0x60] sm:$0xff] %v93_v12  ;;  %96 = vst [vmem:[%s214_s2 + $0x68] sm:$0xff] %v95_v13  ;;  %v99_v15 = vld [vmem:[%s213_s1 + $0x38] sm:$0xff] }
   0x9   :  { %98 = vst [vmem:[%s214_s2 + $0x70] sm:$0xff] %v97_v14  ;;  %100 = vst [vmem:[%s214_s2 + $0x78] sm:$0xff] %v99_v15 }

</bundles_post_ra>
